<compile_context>
chip_gen: v7x
topology: tpu7x:2x2x1
jax: 0.10.0
libtpu: 0.0.40
codegen_flags: <defaults>
</compile_context>

<pallas_src>
import jax
import jax.numpy as jnp
from jax.experimental import pallas as pl
from jax.experimental.pallas import tpu as pltpu

IN_F = 6 * 20        # 120
IN_PAD = 128         # lane-aligned K for fc1
H1, H2, OUT = 100, 20, 2


def _round_up(n, m):
    return ((n + m - 1) // m) * m


def dnn_kernel(x_ref, w1_ref, b1_ref, w2_ref, b2_ref, w3_ref, b3_ref, o_ref):
    # x tile: (TB, 128) bf16; weights bf16; biases f32.
    x = x_ref[...]

    # fc1 + relu (MXU bf16 -> f32 accumulate; ReLU in f32 on the VPU)
    h1 = jnp.dot(x, w1_ref[...], preferred_element_type=jnp.float32) + b1_ref[...]
    h1 = jnp.maximum(h1, 0.0)

    # fc2 + relu
    h2 = jnp.dot(h1.astype(jnp.bfloat16), w2_ref[...],
                 preferred_element_type=jnp.float32) + b2_ref[...]
    h2 = jnp.maximum(h2, 0.0)

    # fc3 -> logits (TB, 2), f32
    logits = jnp.dot(h2.astype(jnp.bfloat16), w3_ref[...],
                     preferred_element_type=jnp.float32) + b3_ref[...]

    # Closed-form 2-class log-softmax (no XLU reduce over the padded 2-lane axis):
    #   d = l0 - l1 ; logp0 = -softplus(-d) ; logp1 = -softplus(d)
    # with the numerically stable softplus(z) = max(z,0) + log1p(exp(-|z|)).
    l0 = logits[:, 0:1]
    l1 = logits[:, 1:2]
    d = l0 - l1

    def softplus(z):
        return jnp.maximum(z, 0.0) + jnp.log1p(jnp.exp(-jnp.abs(z)))

    logp0 = -softplus(-d)
    logp1 = -softplus(d)
    o_ref[...] = jnp.concatenate([logp0, logp1], axis=-1).astype(o_ref.dtype)


def dnn_forward(x, params, max_tile=512):
    """x: any shape whose trailing numel is divisible by 120 (== view(-1, 20*6))."""
    w1, b1, w2, b2, w3, b3 = params
    xf = x.reshape(-1, IN_F)
    B = xf.shape[0]

    # Lane-align the contraction dim: x (B,120)->(B,128), W1 (120,100)->(128,100)
    # with zero padding (zero rows contribute nothing to the matmul).
    xf = jnp.pad(xf, ((0, 0), (0, IN_PAD - IN_F)))
    w1p = jnp.pad(w1, ((0, IN_PAD - IN_F), (0, 0)))

    # Batch tile: multiple of 8, <= max_tile; pad B up to a multiple of it.
    TB = min(max_tile, _round_up(B, 8))
    Bp = _round_up(B, TB)
    if Bp != B:
        xf = jnp.pad(xf, ((0, Bp - B), (0, 0)))

    # bf16 for the HBM-resident / MXU-input arrays; biases stay f32.
    xf = xf.astype(jnp.bfloat16)
    w1b = w1p.astype(jnp.bfloat16)
    w2b = w2.astype(jnp.bfloat16)
    w3b = w3.astype(jnp.bfloat16)

    grid = (Bp // TB,)
    out = pl.pallas_call(
        dnn_kernel,
        out_shape=jax.ShapeDtypeStruct((Bp, OUT), jnp.float32),
        grid=grid,
        in_specs=[
            pl.BlockSpec((TB, IN_PAD), lambda i: (i, 0)),   # x: streamed per tile
            pl.BlockSpec((IN_PAD, H1), lambda i: (0, 0)),   # W1: resident
            pl.BlockSpec((1, H1), lambda i: (0, 0)),        # b1
            pl.BlockSpec((H1, H2), lambda i: (0, 0)),       # W2
            pl.BlockSpec((1, H2), lambda i: (0, 0)),        # b2
            pl.BlockSpec((H2, OUT), lambda i: (0, 0)),      # W3
            pl.BlockSpec((1, OUT), lambda i: (0, 0)),       # b3
        ],
        out_specs=pl.BlockSpec((TB, OUT), lambda i: (i, 0)),
        compiler_params=pltpu.CompilerParams(
            dimension_semantics=("parallel",),
            vmem_limit_bytes=32 << 20,
        ),
    )(xf, w1b, b1, w2b, b2, w3b, b3)

    return out[:B]


def dnn_reference(x, params):
    """Pure-JAX reference (f32) mirroring the PyTorch module."""
    w1, b1, w2, b2, w3, b3 = params
    xf = x.reshape(-1, IN_F)
    h1 = jnp.maximum(xf @ w1 + b1, 0.0)
    h2 = jnp.maximum(h1 @ w2 + b2, 0.0)
    logits = h2 @ w3 + b3
    return jax.nn.log_softmax(logits, axis=-1)


def init_params(key):
    """nn.Linear-style init. Weights stored transposed (in, out); biases (1, out)."""
    dims = [(IN_F, H1), (H1, H2), (H2, OUT)]
    params = []
    for fan_in, fan_out in dims:
        key, kw, kb = jax.random.split(key, 3)
        bound = 1.0 / jnp.sqrt(fan_in)
        w = jax.random.uniform(kw, (fan_in, fan_out), jnp.float32, -bound, bound)
        b = jax.random.uniform(kb, (1, fan_out), jnp.float32, -bound, bound)
        params += [w, b]
    return tuple(params)


if __name__ == "__main__":
    key = jax.random.PRNGKey(0)
    kp, kx = jax.random.split(key)

    params = init_params(kp)
    # Input consistent with the forward's view(-1, 20*6): (batch, 6, 20)
    x = jax.random.normal(kx, (4, 6, 20), jnp.float32)

    out = dnn_forward(x, params)
    out = jax.block_until_ready(out)

    assert out.shape == (4, 2)
    # log_softmax rows must exp-sum to 1
    assert bool(jnp.allclose(jnp.sum(jnp.exp(out), axis=1), 1.0, atol=1e-5))
    # Match the f32 reference (bf16 MXU inputs -> loose tolerance)
    ref = dnn_reference(x, params)
    assert bool(jnp.allclose(out, ref, atol=5e-2)), "mismatch vs reference"
    print("KERNEL_OK")
</pallas_src>

<mosaic_0001>
module attributes {stable_mosaic.version = 11 : i64} {
  func.func @dnn_kernel(%arg0: i32, %arg1: memref<8x128xbf16, #tpu.memory_space<vmem>>, %arg2: memref<128x100xbf16, #tpu.memory_space<vmem>>, %arg3: memref<1x100xf32, #tpu.memory_space<vmem>>, %arg4: memref<100x20xbf16, #tpu.memory_space<vmem>>, %arg5: memref<1x20xf32, #tpu.memory_space<vmem>>, %arg6: memref<20x2xbf16, #tpu.memory_space<vmem>>, %arg7: memref<1x2xf32, #tpu.memory_space<vmem>>, %arg8: memref<8x2xf32, #tpu.memory_space<vmem>>) attributes {dimension_semantics = [#tpu.dimension_semantics<parallel>], iteration_bounds = array<i64: 1>, scalar_prefetch = 0 : i64, scratch_operands = 0 : i64, tpu.core_type = #tpu.core_type<tc>, window_params = [{transform_indices = @transform_0, window_bounds = array<i64: 8, 128>}, {pipeline_mode = #tpu.pipeline_mode<synchronous>, transform_indices = @transform_1, window_bounds = array<i64: 128, 100>}, {pipeline_mode = #tpu.pipeline_mode<synchronous>, transform_indices = @transform_2, window_bounds = array<i64: 1, 100>}, {pipeline_mode = #tpu.pipeline_mode<synchronous>, transform_indices = @transform_3, window_bounds = array<i64: 100, 20>}, {pipeline_mode = #tpu.pipeline_mode<synchronous>, transform_indices = @transform_4, window_bounds = array<i64: 1, 20>}, {pipeline_mode = #tpu.pipeline_mode<synchronous>, transform_indices = @transform_5, window_bounds = array<i64: 20, 2>}, {pipeline_mode = #tpu.pipeline_mode<synchronous>, transform_indices = @transform_6, window_bounds = array<i64: 1, 2>}, {transform_indices = @transform_7, window_bounds = array<i64: 8, 2>}]} {
    %c0 = arith.constant 0 : index
    %c0_0 = arith.constant 0 : index
    %0 = vector.load %arg1[%c0, %c0_0] : memref<8x128xbf16, #tpu.memory_space<vmem>>, vector<8x128xbf16>
    %c0_1 = arith.constant 0 : index
    %c0_2 = arith.constant 0 : index
    %1 = vector.load %arg2[%c0_1, %c0_2] : memref<128x100xbf16, #tpu.memory_space<vmem>>, vector<128x100xbf16>
    %cst = arith.constant dense<0.000000e+00> : vector<8x100xf32>
    %2 = tpu.matmul %0, %1, %cst {dimension_numbers = #tpu.dot_dimension_numbers<[1], [0], [0], [1], [0, 0, 1, 1], [], []>} : vector<8x128xbf16>, vector<128x100xbf16>, vector<8x100xf32> -> vector<8x100xf32>
    %c0_3 = arith.constant 0 : index
    %c0_4 = arith.constant 0 : index
    %3 = vector.load %arg3[%c0_3, %c0_4] : memref<1x100xf32, #tpu.memory_space<vmem>>, vector<1x100xf32>
    %4 = vector.broadcast %3 : vector<1x100xf32> to vector<8x100xf32>
    %5 = arith.addf %2, %4 : vector<8x100xf32>
    %cst_5 = arith.constant 0.000000e+00 : f32
    %6 = vector.broadcast %cst_5 : f32 to vector<8x100xf32>
    %7 = arith.maximumf %5, %6 : vector<8x100xf32>
    %8 = arith.truncf %7 : vector<8x100xf32> to vector<8x100xbf16>
    %c0_6 = arith.constant 0 : index
    %c0_7 = arith.constant 0 : index
    %9 = vector.load %arg4[%c0_6, %c0_7] : memref<100x20xbf16, #tpu.memory_space<vmem>>, vector<100x20xbf16>
    %cst_8 = arith.constant dense<0.000000e+00> : vector<8x20xf32>
    %10 = tpu.matmul %8, %9, %cst_8 {dimension_numbers = #tpu.dot_dimension_numbers<[1], [0], [0], [1], [0, 0, 1, 1], [], []>} : vector<8x100xbf16>, vector<100x20xbf16>, vector<8x20xf32> -> vector<8x20xf32>
    %c0_9 = arith.constant 0 : index
    %c0_10 = arith.constant 0 : index
    %11 = vector.load %arg5[%c0_9, %c0_10] : memref<1x20xf32, #tpu.memory_space<vmem>>, vector<1x20xf32>
    %12 = vector.broadcast %11 : vector<1x20xf32> to vector<8x20xf32>
    %13 = arith.addf %10, %12 : vector<8x20xf32>
    %cst_11 = arith.constant 0.000000e+00 : f32
    %14 = vector.broadcast %cst_11 : f32 to vector<8x20xf32>
    %15 = arith.maximumf %13, %14 : vector<8x20xf32>
    %16 = arith.truncf %15 : vector<8x20xf32> to vector<8x20xbf16>
    %c0_12 = arith.constant 0 : index
    %c0_13 = arith.constant 0 : index
    %17 = vector.load %arg6[%c0_12, %c0_13] : memref<20x2xbf16, #tpu.memory_space<vmem>>, vector<20x2xbf16>
    %cst_14 = arith.constant dense<0.000000e+00> : vector<8x2xf32>
    %18 = tpu.matmul %16, %17, %cst_14 {dimension_numbers = #tpu.dot_dimension_numbers<[1], [0], [0], [1], [0, 0, 1, 1], [], []>} : vector<8x20xbf16>, vector<20x2xbf16>, vector<8x2xf32> -> vector<8x2xf32>
    %c0_15 = arith.constant 0 : index
    %c0_16 = arith.constant 0 : index
    %19 = vector.load %arg7[%c0_15, %c0_16] : memref<1x2xf32, #tpu.memory_space<vmem>>, vector<1x2xf32>
    %20 = vector.broadcast %19 : vector<1x2xf32> to vector<8x2xf32>
    %21 = arith.addf %18, %20 : vector<8x2xf32>
    %22 = vector.extract_strided_slice %21 {offsets = [0, 0], sizes = [8, 1], strides = [1, 1]} : vector<8x2xf32> to vector<8x1xf32>
    %23 = vector.extract_strided_slice %21 {offsets = [0, 1], sizes = [8, 1], strides = [1, 1]} : vector<8x2xf32> to vector<8x1xf32>
    %24 = arith.subf %22, %23 : vector<8x1xf32>
    %cst_17 = arith.constant 0.000000e+00 : f32
    %25 = vector.broadcast %cst_17 : f32 to vector<8x1xf32>
    %26 = arith.subf %25, %24 : vector<8x1xf32>
    %cst_18 = arith.constant 0.000000e+00 : f32
    %27 = vector.broadcast %cst_18 : f32 to vector<8x1xf32>
    %28 = arith.maximumf %26, %27 : vector<8x1xf32>
    %29 = math.absf %26 : vector<8x1xf32>
    %cst_19 = arith.constant 0.000000e+00 : f32
    %30 = vector.broadcast %cst_19 : f32 to vector<8x1xf32>
    %31 = arith.subf %30, %29 : vector<8x1xf32>
    %32 = math.exp %31 : vector<8x1xf32>
    %33 = math.log1p %32 : vector<8x1xf32>
    %34 = arith.addf %28, %33 : vector<8x1xf32>
    %cst_20 = arith.constant 0.000000e+00 : f32
    %35 = vector.broadcast %cst_20 : f32 to vector<8x1xf32>
    %36 = arith.subf %35, %34 : vector<8x1xf32>
    %cst_21 = arith.constant 0.000000e+00 : f32
    %37 = vector.broadcast %cst_21 : f32 to vector<8x1xf32>
    %38 = arith.maximumf %24, %37 : vector<8x1xf32>
    %39 = math.absf %24 : vector<8x1xf32>
    %cst_22 = arith.constant 0.000000e+00 : f32
    %40 = vector.broadcast %cst_22 : f32 to vector<8x1xf32>
    %41 = arith.subf %40, %39 : vector<8x1xf32>
    %42 = math.exp %41 : vector<8x1xf32>
    %43 = math.log1p %42 : vector<8x1xf32>
    %44 = arith.addf %38, %43 : vector<8x1xf32>
    %cst_23 = arith.constant 0.000000e+00 : f32
    %45 = vector.broadcast %cst_23 : f32 to vector<8x1xf32>
    %46 = arith.subf %45, %44 : vector<8x1xf32>
    %47 = tpu.concatenate %36, %46 in 1 : vector<8x1xf32>, vector<8x1xf32> -> vector<8x2xf32>
    %c0_24 = arith.constant 0 : index
    %c0_25 = arith.constant 0 : index
    %48 = vector.load %arg8[%c0_24, %c0_25] : memref<8x2xf32, #tpu.memory_space<vmem>>, vector<8x2xf32>
    tpu.vector_store %arg8[%c0_24, %c0_25], %47 {strides = array<i32>} : memref<8x2xf32, #tpu.memory_space<vmem>>, vector<8x2xf32>,
    return
  }
  func.func @transform_0(%arg0: i32) -> (i32, i32) {
    %c0_i32 = arith.constant 0 : i32
    %c0_i32_0 = arith.constant 0 : i32
    return %arg0, %c0_i32 : i32, i32
  }
  func.func @transform_1(%arg0: i32) -> (i32, i32) {
    %c0_i32 = arith.constant 0 : i32
    %c0_i32_0 = arith.constant 0 : i32
    %c0_i32_1 = arith.constant 0 : i32
    return %c0_i32, %c0_i32_0 : i32, i32
  }
  func.func @transform_2(%arg0: i32) -> (i32, i32) {
    %c0_i32 = arith.constant 0 : i32
    %c0_i32_0 = arith.constant 0 : i32
    %c0_i32_1 = arith.constant 0 : i32
    return %c0_i32, %c0_i32_0 : i32, i32
  }
  func.func @transform_3(%arg0: i32) -> (i32, i32) {
    %c0_i32 = arith.constant 0 : i32
    %c0_i32_0 = arith.constant 0 : i32
    %c0_i32_1 = arith.constant 0 : i32
    return %c0_i32, %c0_i32_0 : i32, i32
  }
  func.func @transform_4(%arg0: i32) -> (i32, i32) {
    %c0_i32 = arith.constant 0 : i32
    %c0_i32_0 = arith.constant 0 : i32
    %c0_i32_1 = arith.constant 0 : i32
    return %c0_i32, %c0_i32_0 : i32, i32
  }
  func.func @transform_5(%arg0: i32) -> (i32, i32) {
    %c0_i32 = arith.constant 0 : i32
    %c0_i32_0 = arith.constant 0 : i32
    %c0_i32_1 = arith.constant 0 : i32
    return %c0_i32, %c0_i32_0 : i32, i32
  }
  func.func @transform_6(%arg0: i32) -> (i32, i32) {
    %c0_i32 = arith.constant 0 : i32
    %c0_i32_0 = arith.constant 0 : i32
    %c0_i32_1 = arith.constant 0 : i32
    return %c0_i32, %c0_i32_0 : i32, i32
  }
  func.func @transform_7(%arg0: i32) -> (i32, i32) {
    %c0_i32 = arith.constant 0 : i32
    %c0_i32_0 = arith.constant 0 : i32
    return %arg0, %c0_i32 : i32, i32
  }
}

</mosaic_0001>

<bundles_post_ra>
// kernel: tpu_custom_call.1
= control target key start
LH: loop header
LB: loop body
LE: loop exit
PB: predicated region body
PF: predicated region fallthrough
CT: control target
= control target key end

     0   :  { %v483_v0 = vmov 0.0   ;;  %vm484_vm0 = vmmov 0   ;;  %vm204_vm1 = vcmask 1041408   ;;  %vm200_vm2 = vcmask 818176   ;;  %s618_s1 = inlined_call_operand.vmem [shape: bf16[128,100], index: 1, kind: input, shape index: {}]   ;;  %s619_s3 = inlined_call_operand.vmem [shape: bf16[100,20], index: 3, kind: input, shape index: {}]   ;;  %s620_s0 = inlined_call_operand.vmem [shape: bf16[8,128], index: 0, kind: input, shape index: {}]   ;;  %s621_s5 = inlined_call_operand.vmem [shape: bf16[20,2], index: 5, kind: input, shape index: {}]   ;;  %s622_s2 = inlined_call_operand.vmem [shape: f32[1,100], index: 2, kind: input, shape index: {}]   ;;  %s623_s4 = inlined_call_operand.vmem [shape: f32[1,20], index: 4, kind: input, shape index: {}]   ;;  %s624_s6 = inlined_call_operand.vmem [shape: f32[1,2], index: 6, kind: input, shape index: {}]   ;;  %s625_s7 = inlined_call_operand.vmem [shape: f32[8,2], index: 7, kind: output, shape index: {}]  }
   0x1   :  { %408 = vmatprep.subr.bf16.mxu0 %v483_v0  ;;  %v458_v1 = vld [vmem:[%s618_s1] sm:$0xff]   ;;  %424 = vmatprep.mubr.msk.bf16.mxu0 %vm484_vm0, %v483_v0  ;;  %v459_v2 = vld [vmem:[%s618_s1 + $0x8] sm:$0xff]   ;;  %v460_v3 = vld [vmem:[%s618_s1 + $0x10] sm:$0xff]   ;;  %vm269_vm3 = vcmask 162816   ;;  %vm358_vm6 = vcmask 7168   ;;  %vm360_vm7 = vcmask 15360  }
   0x2   :  { %428 = vmatprep.subr.bf16.mxu1 %v483_v0  ;;  %442 = vmatprep.mubr.msk.bf16.mxu1 %vm484_vm0, %v483_v0  ;;  %v466_v4 = vld [vmem:[%s619_s3] sm:$0xff]   ;;  %v461_v5 = vld [vmem:[%s618_s1 + $0x18] sm:$0xff]   ;;  %v467_v6 = vld [vmem:[%s619_s3 + $0x8] sm:$0xff]  }
   0x3   :  { %409 = vmatpush3.bf16.msra.mxu0 %v458_v1  ;;  %429 = vmatpush3.bf16.msra.mxu1 %v466_v4  ;;  %v462_v7 = vld [vmem:[%s618_s1 + $0x20] sm:$0xff]   ;;  %v468_v8 = vld [vmem:[%s619_s3 + $0x10] sm:$0xff]   ;;  %v463_v9 = vld [vmem:[%s618_s1 + $0x28] sm:$0xff]  }
   0x4   :  { %410 = vmatprep.subr.bf16.mxu0 %v483_v0  ;;  %430 = vmatprep.subr.bf16.mxu1 %v483_v0  ;;  %v469_v10 = vld [vmem:[%s619_s3 + $0x18] sm:$0xff]   ;;  %v464_v11 = vld [vmem:[%s618_s1 + $0x30] sm:$0xff]   ;;  %v470_v12 = vld [vmem:[%s619_s3 + $0x20] sm:$0xff]  }
   0x5   :  { %v465_v13 = vld [vmem:[%s618_s1 + $0x38] sm:$0xff]   ;;  %v27_v14 = vld [vmem:[%s620_s0] sm:$0xf]  ;;  %v471_v15 = vld [vmem:[%s619_s3 + $0x28] sm:$0xff]  }
   0x6   :  { %v472_v16 = vld [vmem:[%s619_s3 + $0x30] ss:$0 sps:$4 sm:$0x33]   ;;  %v366_v18 = vld [vmem:[%s622_s2] ss:$0 sm:$0xff] }
   0x7   :  { %411 = vmatpush3.bf16.msra.mxu0 %v459_v2  ;;  %431 = vmatpush3.bf16.msra.mxu1 %v467_v6  ;;  %v206_v17 = vsel %vm204_vm1, %v472_v16, 0  ;;  %v473_v25 = vld [vmem:[%s621_s5] sm:$0xff]   ;;  %v474_v27 = vld [vmem:[%s621_s5 + $0x8] ss:$0 sps:$4 sm:$0x33]   ;;  %s485_s5 = smov 127  }
   0x8   :  { %412 = vmatprep.subr.bf16.mxu0 %v483_v0  ;;  %432 = vmatprep.subr.bf16.mxu1 %v483_v0  ;;  %v274_v28 = vsel %vm204_vm1, %v474_v27, 0  ;;  %v375_v29 = vld [vmem:[%s623_s4] ss:$0 sm:$0xff]  ;;  %s486_s4 = smov 1  }
   0x9   :  { %v384_v37 = vld [vmem:[%s624_s6] ss:$0 sm:$0xff] }
   0xb   :  { %413 = vmatpush3.bf16.msra.mxu0 %v460_v3  ;;  %433 = vmatpush3.bf16.msra.mxu1 %v468_v8 }
   0xc   :  { %414 = vmatprep.subr.bf16.mxu0 %v483_v0  ;;  %434 = vmatprep.subr.bf16.mxu1 %v483_v0 }
   0xf   :  { %415 = vmatpush3.bf16.msra.mxu0 %v461_v5  ;;  %435 = vmatpush3.bf16.msra.mxu1 %v469_v10 }
  0x10   :  { %416 = vmatprep.subr.bf16.mxu0 %v483_v0  ;;  %436 = vmatprep.subr.bf16.mxu1 %v483_v0 }
  0x13   :  { %417 = vmatpush3.bf16.msra.mxu0 %v462_v7  ;;  %437 = vmatpush3.bf16.msra.mxu1 %v470_v12 }
  0x14   :  { %418 = vmatprep.subr.bf16.mxu0 %v483_v0  ;;  %438 = vmatprep.subr.bf16.mxu1 %v483_v0 }
  0x17   :  { %419 = vmatpush3.bf16.msra.mxu0 %v463_v9  ;;  %439 = vmatpush3.bf16.msra.mxu1 %v471_v15 }
  0x18   :  { %420 = vmatprep.subr.bf16.mxu0 %v483_v0  ;;  %440 = vmatprep.subr.bf16.mxu1 %v483_v0 }
  0x1b   :  { %421 = vmatpush3.bf16.msra.mxu0 %v464_v11  ;;  %441 = vmatpush3.bf16.msra.mxu1 %v206_v17 }
  0x1c   :  { %422 = vmatprep.subr.bf16.mxu0 %v483_v0  ;;  %446 = vmatprep.subr.bf16.mxu1 %v483_v0 }
  0x1f   :  { %423 = vmatpush3.bf16.msra.mxu0 %v465_v13 }
  0x22   :  { %425 = vmatmul.mubr.bf16.vlgmr.msra.gmra.mrb[0].mxu0 %v27_v14 }
  0xf5   :  { %v133_v19 = vpop.f32.mrb[0].mxu0 }
  0xf6   :  { %v134_v20 = vadd.f32 %v366_v18, %v133_v19  ;;  %v426_v21 = vpop.f32.mrb[1].mxu0 }
  0xf7   :  { %v136_v22 = vpop.f32.mrb[2].mxu0 }
  0xf8   :  { %v139_v23 = vmax.f32 %v134_v20, 0.0  ;;  %v427_v24 = vpop.f32.mrb[3].mxu0 }
  0xfa   :  { %v140_v26 = vpack.c.bf16 %v139_v23, %v139_v23 }
  0xfc   :  { %443 = vmatmul.mubr.msk.bf16.vlgmr.msra.gmra.mrb[0].mxu1 %vm200_vm2, %v140_v26 }
  0xfd   :  { %447 = vmatpush3.bf16.msra.mxu1 %v473_v25  ;;  %450 = vmatprep.mubr.msk.bf16.mxu1 %vm484_vm0, %v483_v0 }
  0xfe   :  { %448 = vmatprep.subr.bf16.mxu1 %v483_v0 }
 0x101   :  { %449 = vmatpush3.bf16.msra.mxu1 %v274_v28 }
 0x1cf   :  { %v242_v30 = vpop.f32.mrb[0].mxu1 }
 0x1d0   :  { %v243_v31 = vadd.f32 %v375_v29, %v242_v30  ;;  %v444_v32 = vpop.f32.mrb[1].mxu1 }
 0x1d1   :  { %v245_v33 = vpop.f32.mrb[2].mxu1 }
 0x1d2   :  { %v248_v34 = vmax.f32 %v243_v31, 0.0  ;;  %v445_v35 = vpop.f32.mrb[3].mxu1 }
 0x1d4   :  { %v249_v36 = vpack.c.bf16 %v248_v34, %v248_v34 }
 0x1d6   :  { %451 = vmatmul.mubr.msk.bf16.vlgmr.msra.gmra.mrb[4].mxu1 %vm269_vm3, %v249_v36 }
 0x2a9   :  { %v310_v38 = vpop.f32.mrb[4].mxu1 }
 0x2aa   :  { %v311_v39 = vadd.f32 %v384_v37, %v310_v38  ;;  %v452_v40 = vpop.f32.mrb[5].mxu1 }
 0x2ab   :  { %v313_v41 = vpop.f32.mrb[6].mxu1 }
 0x2ac   :  { %317 = vrot.lane.b32.xlu0 %v311_v39, %s485_s5  ;;  %v453_v42 = vpop.f32.mrb[7].mxu1 }
 0x31e   :  { %v318_v43 = vpop.permute.xlu0 %317 }
 0x31f   :  { %v320_v44 = vsub.f32 %v311_v39, %v318_v43 }
 0x321   :  { %v339_v45 = vand.u32 2147483647, %v320_v44  ;;  %v338_v56 = vmax.f32 %v320_v44, 0.0  ;;  %v321_v60 = vsub.f32 0.0, %v320_v44 }
 0x323   :  { %v340_v46 = vsub.f32 0.0, %v339_v45  ;;  %v323_v61 = vand.u32 2147483647, %v321_v60  ;;  %v322_v9 = vmax.f32 %v321_v60, 0.0 }
 0x325   :  { %v341_v47 = vmul.f32 1.442695, %v340_v46  ;;  %v324_v62 = vsub.f32 0.0, %v323_v61 }
 0x327   :  { %475 = vpow2.f32 %v341_v47  ;;  %v325_v63 = vmul.f32 1.442695, %v324_v62 }
 0x331   :  { %v476_v48 = vpop.eup %475 }
 0x332   :  { %v343_v49 = vadd.f32 1.0, %v476_v48  ;;  %v346_v50 = vmul.f32 -0.5, %v476_v48  ;;  %v349_v52 = vand.u32 2147483647, %v476_v48 }
 0x334   :  { %477 = vlog2.f32 %v343_v49  ;;  %v347_v51 = vadd.f32 1.0, %v346_v50  ;;  %vm350_vm4 = vcmp.lt.f32.partialorder %v349_v52, 0.0004427343 }
 0x335   :  { %479 = vpow2.f32 %v325_v63 }
 0x336   :  { %v348_v55 = vmul.f32 %v476_v48, %v347_v51 }
 0x33e   :  { %v478_v53 = vpop.eup %477 }
 0x33f   :  { %v345_v54 = vmul.f32 0.6931472, %v478_v53  ;;  %v480_v0 = vpop.eup %479 }
 0x340   :  { %v327_v1 = vadd.f32 1.0, %v480_v0  ;;  %v330_v2 = vmul.f32 -0.5, %v480_v0  ;;  %v333_v5 = vand.u32 2147483647, %v480_v0 }
 0x341   :  { %v351_v57 = vsel %vm350_vm4, %v348_v55, %v345_v54 }
 0x342   :  { %v352_v58 = vadd.f32 %v351_v57, %v338_v56  ;;  %481 = vlog2.f32 %v327_v1  ;;  %v331_v4 = vadd.f32 1.0, %v330_v2  ;;  %vm334_vm5 = vcmp.lt.f32.partialorder %v333_v5, 0.0004427343 }
 0x344   :  { %v353_v59 = vsub.f32 0.0, %v352_v58  ;;  %v332_v7 = vmul.f32 %v480_v0, %v331_v4 }
 0x346   :  { %355 = vrot.lane.b32.xlu0 %v353_v59, %s486_s4 }
 0x34c   :  { %v482_v3 = vpop.eup %481 }
 0x34d   :  { %v329_v6 = vmul.f32 0.6931472, %v482_v3 }
 0x34f   :  { %v335_v8 = vsel %vm334_vm5, %v332_v7, %v329_v6 }
 0x350   :  { %v336_v10 = vadd.f32 %v335_v8, %v322_v9 }
 0x352   :  { %v337_v11 = vsub.f32 0.0, %v336_v10 }
 0x3b8   :  { %v356_v12 = vpop.permute.xlu0 %355 }
 0x3b9   :  { %v359_v13 = vsel %vm358_vm6, %v337_v11, %v356_v12 }
 0x3ba   :  { %361 = vst.msk [vmem:[%s625_s7] sm:$0xff] %vm360_vm7, %v359_v13 }

</bundles_post_ra>
